<compile_context>
chip_gen: v7x
topology: tpu7x:2x2x1
jax: 0.10.0
libtpu: 0.0.40
codegen_flags: <defaults>
</compile_context>

<pallas_src>
import functools

import jax
import jax.numpy as jnp
from jax.experimental import pallas as pl
from jax.experimental.pallas import tpu as pltpu


LANE = 128       # vreg lane width  (last-dim alignment)
SUBLANE = 8      # vreg sublane count (second-to-last-dim alignment)
DEFAULT_TM = 256 # row-tile size; sized so double-buffered tiles fit v7x VMEM
VMEM_LIMIT = 48 * 1024 * 1024  # explicit scoped-VMEM limit (safe on v7x 64MiB)


def _round_up(x, m):
    return (x + m - 1) // m * m


def _pad2d(a, rows, cols):
    r, c = a.shape
    if r == rows and c == cols:
        return a
    return jnp.pad(a, ((0, rows - r), (0, cols - c)))


# ----------------------------------------------------------------------------
# Pallas kernels
# ----------------------------------------------------------------------------
def _linear_kernel(x_ref, w_ref, b_ref, o_ref, *, use_gelu):
    # One row tile: y = act(x @ W + b), f32 MXU accumulation.
    y = jnp.dot(x_ref[...], w_ref[...],
                preferred_element_type=jnp.float32) + b_ref[...]
    if use_gelu:
        y = jax.nn.gelu(y)
    o_ref[...] = y.astype(o_ref.dtype)


def _mlp_fused_kernel(x_ref, w1_ref, b1_ref, w2_ref, b2_ref, o_ref):
    # Fused two-layer MLP on one row tile; intermediate h stays in VMEM/vregs.
    h = jnp.dot(x_ref[...], w1_ref[...],
                preferred_element_type=jnp.float32) + b1_ref[...]
    h = jax.nn.gelu(h)
    o = jnp.dot(h.astype(w2_ref.dtype), w2_ref[...],
                preferred_element_type=jnp.float32) + b2_ref[...]
    o_ref[...] = o.astype(o_ref.dtype)


# ----------------------------------------------------------------------------
# Pallas wrappers (row-tiled grids, lane-dense padded shapes)
# ----------------------------------------------------------------------------
def linear_pallas(x, w, b, *, use_gelu=False, tm=DEFAULT_TM):
    """x: [M, Din], w: [Din, Dout], b: [Dout] -> [M, Dout]."""
    M, Din = x.shape
    Dout = w.shape[1]

    Din_p = _round_up(Din, LANE)
    Dout_p = _round_up(Dout, LANE)
    tm = min(tm, _round_up(M, SUBLANE))
    M_p = _round_up(M, tm)

    x_p = _pad2d(x, M_p, Din_p)
    w_p = _pad2d(w, Din_p, Dout_p)
    b_p = _pad2d(b.reshape(1, Dout), 1, Dout_p)

    kernel = functools.partial(_linear_kernel, use_gelu=use_gelu)
    out = pl.pallas_call(
        kernel,
        out_shape=jax.ShapeDtypeStruct((M_p, Dout_p), x.dtype),
        grid_spec=pltpu.PrefetchScalarGridSpec(
            num_scalar_prefetch=0,
            grid=(M_p // tm,),
            in_specs=[
                pl.BlockSpec((tm, Din_p), lambda i: (i, 0)),
                pl.BlockSpec((Din_p, Dout_p), lambda i: (0, 0)),  # resident W
                pl.BlockSpec((1, Dout_p), lambda i: (0, 0)),      # resident b
            ],
            out_specs=pl.BlockSpec((tm, Dout_p), lambda i: (i, 0)),
        ),
        compiler_params=pltpu.CompilerParams(
            dimension_semantics=("parallel",),
            vmem_limit_bytes=VMEM_LIMIT,
        ),
    )(x_p, w_p, b_p)
    return out[:M, :Dout]


def mlp_fused_pallas(x, w1, b1, w2, b2, *, tm=DEFAULT_TM):
    """Fused GELU-MLP: x:[M,Din] -> gelu(xW1+b1)W2+b2 : [M,Dout]."""
    M, Din = x.shape
    H = w1.shape[1]
    Dout = w2.shape[1]

    Din_p = _round_up(Din, LANE)
    H_p = _round_up(H, LANE)
    Dout_p = _round_up(Dout, LANE)
    tm = min(tm, _round_up(M, SUBLANE))
    M_p = _round_up(M, tm)

    x_p = _pad2d(x, M_p, Din_p)
    w1_p = _pad2d(w1, Din_p, H_p)
    b1_p = _pad2d(b1.reshape(1, H), 1, H_p)
    w2_p = _pad2d(w2, H_p, Dout_p)
    b2_p = _pad2d(b2.reshape(1, Dout), 1, Dout_p)

    out = pl.pallas_call(
        _mlp_fused_kernel,
        out_shape=jax.ShapeDtypeStruct((M_p, Dout_p), x.dtype),
        grid_spec=pltpu.PrefetchScalarGridSpec(
            num_scalar_prefetch=0,
            grid=(M_p // tm,),
            in_specs=[
                pl.BlockSpec((tm, Din_p), lambda i: (i, 0)),
                pl.BlockSpec((Din_p, H_p), lambda i: (0, 0)),     # resident W1
                pl.BlockSpec((1, H_p), lambda i: (0, 0)),         # resident b1
                pl.BlockSpec((H_p, Dout_p), lambda i: (0, 0)),    # resident W2
                pl.BlockSpec((1, Dout_p), lambda i: (0, 0)),      # resident b2
            ],
            out_specs=pl.BlockSpec((tm, Dout_p), lambda i: (i, 0)),
        ),
        compiler_params=pltpu.CompilerParams(
            dimension_semantics=("parallel",),
            vmem_limit_bytes=VMEM_LIMIT,
        ),
    )(x_p, w1_p, b1_p, w2_p, b2_p)
    return out[:M, :Dout]


# ----------------------------------------------------------------------------
# MultiMaskWrapper forward — same control-flow semantics as the nn.Module
# ----------------------------------------------------------------------------
def multimask_wrapper_forward(params, x, masks=None):
    """x: [B, N, Din].  masks: None | [B, K] int32 | list of [B, K] int32."""
    B, N, Din = x.shape

    if masks is None:
        # Unmasked path: layer1+GELU+layer2 fused in a single pallas_call;
        # the intermediate activations never round-trip HBM.
        out = mlp_fused_pallas(x.reshape(B * N, Din),
                               params["w1"], params["b1"],
                               params["w2"], params["b2"])
        return out.reshape(B, N, -1)

    if not isinstance(masks, list):
        masks = [masks]

    # Layer 1 is mask-invariant -> compute ONCE and reuse across masks
    # (equivalent to calling backbone(x, masks=m) per mask, but M× cheaper).
    h = linear_pallas(x.reshape(B * N, Din), params["w1"], params["b1"],
                      use_gelu=True)
    H = h.shape[-1]
    h = h.reshape(B, N, H)

    outs = []
    for m in masks:
        # token gather = layout plumbing, stays in plain JAX
        # TODO(synk): fusing this gather into the layer-2 pallas_call via
        # scalar-prefetch row indices would skip one HBM round-trip of h.
        hm = jnp.take_along_axis(h, m[:, :, None], axis=1)  # [B, K, H]
        K = hm.shape[1]
        o = linear_pallas(hm.reshape(B * K, H), params["w2"], params["b2"],
                          use_gelu=False)
        outs.append(o.reshape(B, K, -1))
    return outs


# ----------------------------------------------------------------------------
# Deterministic parameter init + example run
# ----------------------------------------------------------------------------
def init_params(key, d_in, d_hidden, d_out):
    k1, k2, k3, k4 = jax.random.split(key, 4)
    return {
        "w1": jax.random.normal(k1, (d_in, d_hidden), jnp.float32) * 0.02,
        "b1": jax.random.normal(k2, (d_hidden,), jnp.float32) * 0.02,
        "w2": jax.random.normal(k3, (d_hidden, d_out), jnp.float32) * 0.02,
        "b2": jax.random.normal(k4, (d_out,), jnp.float32) * 0.02,
    }


if __name__ == "__main__":
    B, N, D_IN, D_HID, D_OUT, K = 2, 16, 32, 64, 32, 8

    key = jax.random.PRNGKey(0)
    k_params, k_x, k_m1, k_m2 = jax.random.split(key, 4)

    params = init_params(k_params, D_IN, D_HID, D_OUT)
    x = jax.random.normal(k_x, (B, N, D_IN), jnp.float32)

    # two masks, each [B, K] token indices into the N tokens
    mask1 = jax.random.permutation(k_m1, N)[:K][None, :].repeat(B, axis=0)
    mask2 = jax.random.permutation(k_m2, N)[:K][None, :].repeat(B, axis=0)
    mask1 = mask1.astype(jnp.int32)
    mask2 = mask2.astype(jnp.int32)

    # case 1: no masks -> single output [B, N, D_OUT]
    out_none = multimask_wrapper_forward(params, x, masks=None)
    out_none = jax.block_until_ready(out_none)
    assert out_none.shape == (B, N, D_OUT)

    # case 2: single (non-list) mask -> list of one output [B, K, D_OUT]
    out_single = multimask_wrapper_forward(params, x, masks=mask1)
    out_single = jax.block_until_ready(out_single)
    assert isinstance(out_single, list) and len(out_single) == 1
    assert out_single[0].shape == (B, K, D_OUT)

    # case 3: list of masks -> list of outputs, one per mask
    outs = multimask_wrapper_forward(params, x, masks=[mask1, mask2])
    outs = jax.block_until_ready(outs)
    assert isinstance(outs, list) and len(outs) == 2
    assert all(o.shape == (B, K, D_OUT) for o in outs)

    # correctness check vs. a pure-JAX reference of the backbone
    def ref_backbone(x, m=None):
        h = jax.nn.gelu(
            jnp.einsum("bnd,dh->bnh", x, params["w1"]) + params["b1"])
        if m is not None:
            h = jnp.take_along_axis(h, m[:, :, None], axis=1)
        return jnp.einsum("bkh,ho->bko", h, params["w2"]) + params["b2"]

    assert jnp.allclose(out_none, ref_backbone(x), atol=1e-5)
    assert jnp.allclose(out_single[0], ref_backbone(x, mask1), atol=1e-5)
    assert jnp.allclose(outs[0], ref_backbone(x, mask1), atol=1e-5)
    assert jnp.allclose(outs[1], ref_backbone(x, mask2), atol=1e-5)

    print("KERNEL_OK")
</pallas_src>

<mosaic_0001>
module attributes {stable_mosaic.version = 11 : i64} {
  func.func @_mlp_fused_kernel(%arg0: i32, %arg1: memref<32x128xf32, #tpu.memory_space<vmem>>, %arg2: memref<128x128xf32, #tpu.memory_space<vmem>>, %arg3: memref<1x128xf32, #tpu.memory_space<vmem>>, %arg4: memref<128x128xf32, #tpu.memory_space<vmem>>, %arg5: memref<1x128xf32, #tpu.memory_space<vmem>>, %arg6: memref<32x128xf32, #tpu.memory_space<vmem>>) attributes {dimension_semantics = [#tpu.dimension_semantics<parallel>], iteration_bounds = array<i64: 1>, scalar_prefetch = 0 : i64, scratch_operands = 0 : i64, tpu.core_type = #tpu.core_type<tc>, window_params = [{transform_indices = @transform_0, window_bounds = array<i64: 32, 128>}, {pipeline_mode = #tpu.pipeline_mode<synchronous>, transform_indices = @transform_1, window_bounds = array<i64: 128, 128>}, {pipeline_mode = #tpu.pipeline_mode<synchronous>, transform_indices = @transform_2, window_bounds = array<i64: 1, 128>}, {pipeline_mode = #tpu.pipeline_mode<synchronous>, transform_indices = @transform_3, window_bounds = array<i64: 128, 128>}, {pipeline_mode = #tpu.pipeline_mode<synchronous>, transform_indices = @transform_4, window_bounds = array<i64: 1, 128>}, {transform_indices = @transform_5, window_bounds = array<i64: 32, 128>}]} {
    %c0 = arith.constant 0 : index
    %c0_0 = arith.constant 0 : index
    %0 = vector.load %arg1[%c0, %c0_0] : memref<32x128xf32, #tpu.memory_space<vmem>>, vector<32x128xf32>
    %c0_1 = arith.constant 0 : index
    %c0_2 = arith.constant 0 : index
    %1 = vector.load %arg2[%c0_1, %c0_2] : memref<128x128xf32, #tpu.memory_space<vmem>>, vector<128x128xf32>
    %cst = arith.constant dense<0.000000e+00> : vector<32x128xf32>
    %2 = tpu.matmul %0, %1, %cst {dimension_numbers = #tpu.dot_dimension_numbers<[1], [0], [0], [1], [0, 0, 1, 1], [], []>} : vector<32x128xf32>, vector<128x128xf32>, vector<32x128xf32> -> vector<32x128xf32>
    %c0_3 = arith.constant 0 : index
    %c0_4 = arith.constant 0 : index
    %3 = vector.load %arg3[%c0_3, %c0_4] : memref<1x128xf32, #tpu.memory_space<vmem>>, vector<1x128xf32>
    %4 = vector.broadcast %3 : vector<1x128xf32> to vector<32x128xf32>
    %5 = arith.addf %2, %4 : vector<32x128xf32>
    %6 = arith.mulf %5, %5 : vector<32x128xf32>
    %7 = arith.mulf %5, %6 : vector<32x128xf32>
    %cst_5 = arith.constant 4.471500e-02 : f32
    %8 = vector.broadcast %cst_5 : f32 to vector<32x128xf32>
    %9 = arith.mulf %8, %7 : vector<32x128xf32>
    %10 = arith.addf %5, %9 : vector<32x128xf32>
    %cst_6 = arith.constant 0.797884583 : f32
    %11 = vector.broadcast %cst_6 : f32 to vector<32x128xf32>
    %12 = arith.mulf %11, %10 : vector<32x128xf32>
    %13 = math.tanh %12 : vector<32x128xf32>
    %cst_7 = arith.constant 1.000000e+00 : f32
    %14 = vector.broadcast %cst_7 : f32 to vector<32x128xf32>
    %15 = arith.addf %14, %13 : vector<32x128xf32>
    %cst_8 = arith.constant 5.000000e-01 : f32
    %16 = vector.broadcast %cst_8 : f32 to vector<32x128xf32>
    %17 = arith.mulf %16, %15 : vector<32x128xf32>
    %18 = arith.mulf %5, %17 : vector<32x128xf32>
    %c0_9 = arith.constant 0 : index
    %c0_10 = arith.constant 0 : index
    %19 = vector.load %arg4[%c0_9, %c0_10] : memref<128x128xf32, #tpu.memory_space<vmem>>, vector<128x128xf32>
    %cst_11 = arith.constant dense<0.000000e+00> : vector<32x128xf32>
    %20 = tpu.matmul %18, %19, %cst_11 {dimension_numbers = #tpu.dot_dimension_numbers<[1], [0], [0], [1], [0, 0, 1, 1], [], []>} : vector<32x128xf32>, vector<128x128xf32>, vector<32x128xf32> -> vector<32x128xf32>
    %c0_12 = arith.constant 0 : index
    %c0_13 = arith.constant 0 : index
    %21 = vector.load %arg5[%c0_12, %c0_13] : memref<1x128xf32, #tpu.memory_space<vmem>>, vector<1x128xf32>
    %22 = vector.broadcast %21 : vector<1x128xf32> to vector<32x128xf32>
    %23 = arith.addf %20, %22 : vector<32x128xf32>
    %c0_14 = arith.constant 0 : index
    %c0_15 = arith.constant 0 : index
    %24 = vector.load %arg6[%c0_14, %c0_15] : memref<32x128xf32, #tpu.memory_space<vmem>>, vector<32x128xf32>
    tpu.vector_store %arg6[%c0_14, %c0_15], %23 {strides = array<i32>} : memref<32x128xf32, #tpu.memory_space<vmem>>, vector<32x128xf32>,
    return
  }
  func.func @transform_0(%arg0: i32) -> (i32, i32) {
    %c0_i32 = arith.constant 0 : i32
    %c0_i32_0 = arith.constant 0 : i32
    return %arg0, %c0_i32 : i32, i32
  }
  func.func @transform_1(%arg0: i32) -> (i32, i32) {
    %c0_i32 = arith.constant 0 : i32
    %c0_i32_0 = arith.constant 0 : i32
    %c0_i32_1 = arith.constant 0 : i32
    return %c0_i32, %c0_i32_0 : i32, i32
  }
  func.func @transform_2(%arg0: i32) -> (i32, i32) {
    %c0_i32 = arith.constant 0 : i32
    %c0_i32_0 = arith.constant 0 : i32
    %c0_i32_1 = arith.constant 0 : i32
    return %c0_i32, %c0_i32_0 : i32, i32
  }
  func.func @transform_3(%arg0: i32) -> (i32, i32) {
    %c0_i32 = arith.constant 0 : i32
    %c0_i32_0 = arith.constant 0 : i32
    %c0_i32_1 = arith.constant 0 : i32
    return %c0_i32, %c0_i32_0 : i32, i32
  }
  func.func @transform_4(%arg0: i32) -> (i32, i32) {
    %c0_i32 = arith.constant 0 : i32
    %c0_i32_0 = arith.constant 0 : i32
    %c0_i32_1 = arith.constant 0 : i32
    return %c0_i32, %c0_i32_0 : i32, i32
  }
  func.func @transform_5(%arg0: i32) -> (i32, i32) {
    %c0_i32 = arith.constant 0 : i32
    %c0_i32_0 = arith.constant 0 : i32
    return %arg0, %c0_i32 : i32, i32
  }
}

</mosaic_0001>

<bundles_post_ra>
// kernel: tpu_custom_call.1
= control target key start
LH: loop header
LB: loop body
LE: loop exit
PB: predicated region body
PF: predicated region fallthrough
CT: control target
= control target key end

     0   :  { %10 = vsyncpa [#allocation3], 0  ;;  %s739_s0 = inlined_call_operand.hbm [shape: f32[32,128], index: 0, kind: input, shape index: {}]   ;;  %s740_s1 = inlined_call_operand.hbm [shape: f32[128,128], index: 1, kind: input, shape index: {}]   ;;  %s741_s2 = inlined_call_operand.vmem [shape: f32[1,128], index: 2, kind: input, shape index: {}]   ;;  %s742_s3 = inlined_call_operand.hbm [shape: f32[128,128], index: 3, kind: input, shape index: {}]   ;;  %s743_s4 = inlined_call_operand.vmem [shape: f32[1,128], index: 4, kind: input, shape index: {}]   ;;  %s744_s5 = inlined_call_operand.hbm [shape: f32[32,128], index: 5, kind: output, shape index: {}]  }
   0x1   :  { %11 = vsyncpa [#allocation6], 0 }
   0x2   :  { %12 = vsyncpa [#allocation4], 0  ;;  %s630_s18 = smov [#allocation5]   ;;  %s631_s20 = smov [#allocation2]  }
   0x3   :  { %s30_s19 = sshll.u32 %s630_s18, 4  ;;  %s18_s21 = sshll.u32 %s631_s20, 4  ;;  %s31_s19 = int_to_ptr.vmem [resolvable:$true] %s30_s19  ;;  %s666_s21 = int_to_ptr.vmem [resolvable:$true] %s18_s21 }
   0x4   :  { %s536_s24 = scalar_lea.hbm %s740_s1, 2048 }
   0x5   :  { %p537_p0 = scmp.ne.s32.totalorder %s740_s1, %s536_s24  ;;  %p540_p1 = scmp.lt.u32.totalorder %s536_s24, %s740_s1 }
   0x7   :  { %p542_p2 = pnand %p540_p1, %p537_p0 }
   0x9   :  { %545 = shalt.err (!%p542_p2)
}
   0xa   :  { %s546_s29 = scalar_lea.vmem %s31_s19, 2048  ;;  %p551_p4 = scmp.lt.s32.totalorder %s31_s19, %s31_s19 }
   0xb   :  { %p547_p3 = scmp.ne.s32.totalorder %s31_s19, %s546_s29  ;;  %p552_p5 = scmp.lt.s32.totalorder %s546_s29, %s546_s29 }
   0xd   :  { %p553_p6 = por %p552_p5, %p551_p4 }
   0xf   :  { %p554_p7 = pnand %p553_p6, %p547_p3 }
  0x11   :  { %557 = shalt.err (!%p554_p7)
}
  0x12   :  { %s632_s30 = smov 128   ;;  %s633_s6 = smov 8  }
  0x13   :  { %36 = dma.hbm_to_vmem [thread:$0]  %s740_s1, 2048, %s31_s19, [#allocation6], %s632_s30, %s632_s30, %s633_s6  }
  0x14   :  { %s558_s11 = scalar_lea.hbm %s739_s0, 512 }
  0x15   :  { %p559_p8 = scmp.ne.s32.totalorder %s739_s0, %s558_s11  ;;  %p562_p9 = scmp.lt.u32.totalorder %s558_s11, %s739_s0 }
  0x17   :  { %p564_p10 = pnand %p562_p9, %p559_p8 }
  0x19   :  { %567 = shalt.err (!%p564_p10)
}
  0x1a   :  { %s568_s16 = scalar_lea.vmem %s666_s21, 512  ;;  %p573_p12 = scmp.lt.s32.totalorder %s666_s21, %s666_s21 }
  0x1b   :  { %p569_p11 = scmp.ne.s32.totalorder %s666_s21, %s568_s16  ;;  %p574_p13 = scmp.lt.s32.totalorder %s568_s16, %s568_s16 }
  0x1d   :  { %p575_p0 = por %p574_p13, %p573_p12 }
  0x1f   :  { %p576_p1 = pnand %p575_p0, %p569_p11 }
  0x21   :  { %579 = shalt.err (!%p576_p1)
}
  0x22   :  { %24 = dma.hbm_to_vmem [thread:$0]  %s739_s0, 512, %s666_s21, [#allocation3], %s632_s30, %s632_s30, %s633_s6  }
  0x23   :  { %s634_s18 = smov [#allocation7]   ;;  %s580_s23 = scalar_lea.hbm %s742_s3, 2048 }
  0x24   :  { %s44_s19 = sshll.u32 %s634_s18, 4  ;;  %p581_p2 = scmp.ne.s32.totalorder %s742_s3, %s580_s23  ;;  %s45_s19 = int_to_ptr.vmem [resolvable:$true] %s44_s19 }
  0x25   :  { %p584_p3 = scmp.lt.u32.totalorder %s580_s23, %s742_s3 }
  0x27   :  { %p586_p4 = pnand %p584_p3, %p581_p2 }
  0x29   :  { %589 = shalt.err (!%p586_p4)
}
  0x2a   :  { %s590_s28 = scalar_lea.vmem %s45_s19, 2048  ;;  %p595_p6 = scmp.lt.s32.totalorder %s45_s19, %s45_s19 }
  0x2b   :  { %p591_p5 = scmp.ne.s32.totalorder %s45_s19, %s590_s28  ;;  %p596_p7 = scmp.lt.s32.totalorder %s590_s28, %s590_s28 }
  0x2d   :  { %p597_p8 = por %p596_p7, %p595_p6 }
  0x2f   :  { %p598_p9 = pnand %p597_p8, %p591_p5 }
  0x31   :  { %601 = shalt.err (!%p598_p9)
}
  0x32   :  { %50 = dma.hbm_to_vmem [thread:$0]  %s742_s3, 2048, %s45_s19, [#allocation6], %s632_s30, %s632_s30, %s633_s6  }
  0x33   :  { %624 = dma.done.wait [#allocation3], 512  }
  0x34   :  { %625 = vsyncadd [#allocation3], 4294966784 }
  0x35   :  { %626 = dma.done.wait [#allocation6], 4096  }
  0x36   :  { %627 = vsyncadd [#allocation6], 4294963200  ;;  %v66_v0 = vld [vmem:[#allocation5] sm:$0xff]  ;;  %v67_v1 = vld [vmem:[#allocation5 + $0x8] sm:$0xff]  ;;  %s635_s8 = smov [#allocation8]  }
  0x37   :  { %v68_v2 = vld [vmem:[#allocation5 + $0x10] sm:$0xff]  ;;  %v458_v3 = vpack.c.bf16 %v67_v1, %v66_v0  ;;  %v69_v4 = vld [vmem:[#allocation5 + $0x18] sm:$0xff]  ;;  %v70_v6 = vld [vmem:[#allocation5 + $0x20] sm:$0xff]  ;;  %s327_s9 = sshll.u32 %s635_s8, 4  ;;  %s328_s9 = int_to_ptr.vmem [resolvable:$true] %s327_s9 }
  0x38   :  { %v462_v5 = vpack.c.bf16 %v69_v4, %v68_v2  ;;  %v71_v7 = vld [vmem:[#allocation5 + $0x28] sm:$0xff]  ;;  %v62_v9 = vld [vmem:[#allocation2] sm:$0xff]  ;;  %v72_v10 = vld [vmem:[#allocation5 + $0x30] sm:$0xff]  ;;  %s602_s10 = scalar_lea.vmem %s328_s9, 512  ;;  %p607_p11 = scmp.lt.s32.totalorder %s328_s9, %s328_s9 }
  0x39   :  { %459 = vmatprep.subr.bf16.mxu0 %v458_v3  ;;  %v466_v8 = vpack.c.bf16 %v71_v7, %v70_v6  ;;  %v73_v11 = vld [vmem:[#allocation5 + $0x38] sm:$0xff]  ;;  %414 = vmatprep.mubr.f32.mxu0 %v62_v9  ;;  %v74_v13 = vld [vmem:[#allocation5 + $0x40] sm:$0xff]  ;;  %v75_v14 = vld [vmem:[#allocation5 + $0x48] sm:$0xff]  ;;  %p603_p10 = scmp.ne.s32.totalorder %s328_s9, %s602_s10  ;;  %p608_p12 = scmp.lt.s32.totalorder %s602_s10, %s602_s10 }
  0x3a   :  { %461 = vmatpush3.bf16.msra.mxu0 %v458_v3  ;;  %v470_v12 = vpack.c.bf16 %v73_v11, %v72_v10  ;;  %v474_v15 = vpack.c.bf16 %v75_v14, %v74_v13  ;;  %v76_v16 = vld [vmem:[#allocation5 + $0x50] sm:$0xff]  ;;  %v77_v17 = vld [vmem:[#allocation5 + $0x58] sm:$0xff]  ;;  %v78_v19 = vld [vmem:[#allocation5 + $0x60] sm:$0xff] }
  0x3b   :  { %463 = vmatprep.subr.bf16.mxu0 %v462_v5  ;;  %v478_v18 = vpack.c.bf16 %v77_v17, %v76_v16  ;;  %v79_v20 = vld [vmem:[#allocation5 + $0x68] sm:$0xff]  ;;  %v80_v22 = vld [vmem:[#allocation5 + $0x70] sm:$0xff]  ;;  %v81_v23 = vld [vmem:[#allocation5 + $0x78] sm:$0xff]  ;;  %p609_p13 = por %p608_p12, %p607_p11 }
  0x3c   :  { %v482_v21 = vpack.c.bf16 %v79_v20, %v78_v19  ;;  %v486_v24 = vpack.c.bf16 %v81_v23, %v80_v22  ;;  %v63_v25 = vld [vmem:[#allocation2 + $0x8] sm:$0xff]  ;;  %v64_v26 = vld [vmem:[#allocation2 + $0x10] sm:$0xff]  ;;  %v65_v27 = vld [vmem:[#allocation2 + $0x18] sm:$0xff] }
  0x3d   :  { %v210_v28 = vld [vmem:[#allocation7] sm:$0xff]  ;;  %v211_v29 = vld [vmem:[#allocation7 + $0x8] sm:$0xff]  ;;  %v212_v31 = vld [vmem:[#allocation7 + $0x10] sm:$0xff]  ;;  %p610_p0 = pnand %p609_p13, %p603_p10 }
  0x3e   :  { %465 = vmatpush3.bf16.msra.mxu0 %v462_v5  ;;  %v490_v30 = vpack.c.bf16 %v211_v29, %v210_v28  ;;  %v213_v32 = vld [vmem:[#allocation7 + $0x18] sm:$0xff]  ;;  %v214_v34 = vld [vmem:[#allocation7 + $0x20] sm:$0xff]  ;;  %v215_v35 = vld [vmem:[#allocation7 + $0x28] sm:$0xff] }
  0x3f   :  { %467 = vmatprep.subr.bf16.mxu0 %v466_v8  ;;  %v494_v33 = vpack.c.bf16 %v213_v32, %v212_v31  ;;  %v498_v36 = vpack.c.bf16 %v215_v35, %v214_v34  ;;  %v216_v37 = vld [vmem:[#allocation7 + $0x30] sm:$0xff]  ;;  %v217_v38 = vld [vmem:[#allocation7 + $0x38] sm:$0xff]  ;;  %v218_v40 = vld [vmem:[#allocation7 + $0x40] sm:$0xff] }
  0x40   :  { %491 = vmatprep.subr.bf16.mxu1 %v490_v30  ;;  %v502_v39 = vpack.c.bf16 %v217_v38, %v216_v37  ;;  %v219_v41 = vld [vmem:[#allocation7 + $0x48] sm:$0xff]  ;;  %v220_v43 = vld [vmem:[#allocation7 + $0x50] sm:$0xff]  ;;  %v221_v44 = vld [vmem:[#allocation7 + $0x58] sm:$0xff] }
  0x41   :  { %493 = vmatpush3.bf16.msra.mxu1 %v490_v30  ;;  %v506_v42 = vpack.c.bf16 %v219_v41, %v218_v40  ;;  %v222_v45 = vld [vmem:[#allocation7 + $0x60] sm:$0xff]  ;;  %v510_v46 = vpack.c.bf16 %v221_v44, %v220_v43  ;;  %v223_v47 = vld [vmem:[#allocation7 + $0x68] sm:$0xff]  ;;  %v224_v49 = vld [vmem:[#allocation7 + $0x70] sm:$0xff] }
  0x42   :  { %469 = vmatpush3.bf16.msra.mxu0 %v466_v8  ;;  %495 = vmatprep.subr.bf16.mxu1 %v494_v33  ;;  %v514_v48 = vpack.c.bf16 %v223_v47, %v222_v45  ;;  %v225_v50 = vld [vmem:[#allocation7 + $0x78] sm:$0xff]  ;;  %v340_v52 = vld [vmem:[%s741_s2] ss:$0 sm:$0xff] }
  0x43   :  { %471 = vmatprep.subr.bf16.mxu0 %v470_v12  ;;  %v518_v51 = vpack.c.bf16 %v225_v50, %v224_v49 }
  0x45   :  { %497 = vmatpush3.bf16.msra.mxu1 %v494_v33  ;;  %v341_v33 = vld [vmem:[%s743_s4] ss:$0 sm:$0xff] }
  0x46   :  { %473 = vmatpush3.bf16.msra.mxu0 %v470_v12  ;;  %499 = vmatprep.subr.bf16.mxu1 %v498_v36 }
  0x47   :  { %475 = vmatprep.subr.bf16.mxu0 %v474_v15 }
  0x49   :  { %501 = vmatpush3.bf16.msra.mxu1 %v498_v36 }
  0x4a   :  { %477 = vmatpush3.bf16.msra.mxu0 %v474_v15  ;;  %503 = vmatprep.subr.bf16.mxu1 %v502_v39 }
  0x4b   :  { %479 = vmatprep.subr.bf16.mxu0 %v478_v18 }
  0x4d   :  { %505 = vmatpush3.bf16.msra.mxu1 %v502_v39 }
  0x4e   :  { %481 = vmatpush3.bf16.msra.mxu0 %v478_v18  ;;  %507 = vmatprep.subr.bf16.mxu1 %v506_v42 }
  0x4f   :  { %483 = vmatprep.subr.bf16.mxu0 %v482_v21 }
  0x51   :  { %509 = vmatpush3.bf16.msra.mxu1 %v506_v42 }
  0x52   :  { %485 = vmatpush3.bf16.msra.mxu0 %v482_v21  ;;  %511 = vmatprep.subr.bf16.mxu1 %v510_v46 }
  0x53   :  { %487 = vmatprep.subr.bf16.mxu0 %v486_v24 }
  0x55   :  { %513 = vmatpush3.bf16.msra.mxu1 %v510_v46 }
  0x56   :  { %489 = vmatpush3.bf16.msra.mxu0 %v486_v24  ;;  %515 = vmatprep.subr.bf16.mxu1 %v514_v48 }
  0x59   :  { %415 = vmatmul.mubr.f32.vlgmr.msra.gmra.mrb[0].mxu0 %v63_v25  ;;  %517 = vmatpush3.bf16.msra.mxu1 %v514_v48 }
  0x5a   :  { %417 = vmatprep.mubr.f32.mxu0 %v64_v26  ;;  %519 = vmatprep.subr.bf16.mxu1 %v518_v51 }
  0x5d   :  { %418 = vmatmul.mubr.f32.gmra.mrb[2].mxu0 %v65_v27  ;;  %521 = vmatpush3.bf16.msra.mxu1 %v518_v51 }
 0x12c   :  { %v416_v53 = vpop.f32.mrb[0].mxu0 }
 0x12d   :  { %v161_v54 = vadd.f32 %v416_v53, %v340_v52  ;;  %v155_v55 = vpop.f32.mrb[1].mxu0 }
 0x12e   :  { %v156_v56 = vadd.f32 %v340_v52, %v155_v55 }
 0x12f   :  { %v175_v57 = vmul.f32 %v161_v54, %v161_v54 }
 0x130   :  { %v174_v58 = vmul.f32 %v156_v56, %v156_v56  ;;  %v419_v59 = vpop.f32.mrb[2].mxu0 }
 0x131   :  { %v179_v60 = vmul.f32 %v175_v57, %v161_v54  ;;  %v171_v61 = vadd.f32 %v419_v59, %v340_v52  ;;  %v165_v62 = vpop.f32.mrb[3].mxu0 }
 0x132   :  { %v178_v63 = vmul.f32 %v174_v58, %v156_v56  ;;  %v166_v0 = vadd.f32 %v340_v52, %v165_v62 }
 0x133   :  { %v183_v1 = vmul.f32 0.044715, %v179_v60  ;;  %v177_v2 = vmul.f32 %v171_v61, %v171_v61 }
 0x134   :  { %v176_v3 = vmul.f32 %v166_v0, %v166_v0  ;;  %v182_v4 = vmul.f32 0.044715, %v178_v63 }
 0x135   :  { %v187_v5 = vadd.f32 %v183_v1, %v161_v54  ;;  %v181_v6 = vmul.f32 %v177_v2, %v171_v61 }
 0x136   :  { %v180_v7 = vmul.f32 %v176_v3, %v166_v0  ;;  %v186_v8 = vadd.f32 %v182_v4, %v156_v56 }
 0x137   :  { %v191_v9 = vmul.f32 0.7978846, %v187_v5  ;;  %v185_v10 = vmul.f32 0.044715, %v181_v6 }
 0x138   :  { %v184_v11 = vmul.f32 0.044715, %v180_v7  ;;  %v190_v12 = vmul.f32 0.7978846, %v186_v8 }
 0x139   :  { %v189_v13 = vadd.f32 %v185_v10, %v171_v61  ;;  %528 = vtanh.f32 %v191_v9 }
 0x13a   :  { %v188_v14 = vadd.f32 %v184_v11, %v166_v0  ;;  %530 = vtanh.f32 %v190_v12 }
 0x13b   :  { %v193_v15 = vmul.f32 0.7978846, %v189_v13 }
 0x13c   :  { %v192_v16 = vmul.f32 0.7978846, %v188_v14 }
 0x13d   :  { %532 = vtanh.f32 %v193_v15 }
 0x13e   :  { %534 = vtanh.f32 %v192_v16 }
 0x143   :  { %v529_v17 = vpop.eup %528 }
 0x144   :  { %v531_v18 = vpop.eup %530  ;;  %v199_v19 = vadd.f32 1.0, %v529_v17 }
 0x145   :  { %v198_v20 = vadd.f32 1.0, %v531_v18 }
 0x146   :  { %v203_v21 = vmul.f32 0.5, %v199_v19 }
 0x147   :  { %v533_v22 = vpop.eup %532  ;;  %v202_v23 = vmul.f32 0.5, %v198_v20 }
 0x148   :  { %v535_v24 = vpop.eup %534  ;;  %v201_v25 = vadd.f32 1.0, %v533_v22  ;;  %v207_v28 = vmul.f32 %v203_v21, %v161_v54 }
 0x149   :  { %v206_v26 = vmul.f32 %v202_v23, %v156_v56  ;;  %v200_v27 = vadd.f32 1.0, %v535_v24 }
 0x14a   :  { %v205_v29 = vmul.f32 0.5, %v201_v25 }
 0x14b   :  { %452 = vmatprep.mubr.f32.mxu1 %v206_v26  ;;  %v204_v30 = vmul.f32 0.5, %v200_v27 }
 0x14c   :  { %453 = vmatmul.mubr.f32.vlgmr.msra.gmra.mrb[0].mxu1 %v207_v28  ;;  %v209_v32 = vmul.f32 %v205_v29, %v171_v61 }
 0x14d   :  { %v208_v31 = vmul.f32 %v204_v30, %v166_v0 }
 0x14f   :  { %455 = vmatprep.mubr.f32.mxu1 %v208_v31 }
 0x150   :  { %456 = vmatmul.mubr.f32.gmra.mrb[2].mxu1 %v209_v32 }
 0x21f   :  { %v454_v34 = vpop.f32.mrb[0].mxu1 }
 0x220   :  { %v305_v35 = vadd.f32 %v454_v34, %v341_v33  ;;  %v299_v36 = vpop.f32.mrb[1].mxu1 }
 0x221   :  { %v300_v37 = vadd.f32 %v341_v33, %v299_v36 }
 0x222   :  { %319 = vst [vmem:[#allocation8 + $0x8] sm:$0xff] %v305_v35 }
 0x223   :  { %318 = vst [vmem:[#allocation8] sm:$0xff] %v300_v37  ;;  %v457_v38 = vpop.f32.mrb[2].mxu1 }
 0x224   :  { %v315_v39 = vadd.f32 %v457_v38, %v341_v33  ;;  %v309_v40 = vpop.f32.mrb[3].mxu1 }
 0x225   :  { %v310_v41 = vadd.f32 %v341_v33, %v309_v40 }
 0x226   :  { %321 = vst [vmem:[#allocation8 + $0x18] sm:$0xff] %v315_v39 }
 0x227   :  { %320 = vst [vmem:[#allocation8 + $0x10] sm:$0xff] %v310_v41 }
 0x228   :  { %613 = shalt.err (!%p610_p0)
}
 0x229   :  { %s614_s12 = scalar_lea.hbm %s744_s5, 512 }
 0x22a   :  { %p615_p1 = scmp.ne.s32.totalorder %s744_s5, %s614_s12  ;;  %p618_p2 = scmp.lt.u32.totalorder %s614_s12, %s744_s5 }
 0x22c   :  { %p620_p3 = pnand %p618_p2, %p615_p1 }
 0x22e   :  { %623 = shalt.err (!%p620_p3)
}
 0x22f   :  { %333 = dma.vmem_to_hbm [thread:$0]  %s328_s9, 512, %s744_s5, [#allocation4], %s632_s30, %s632_s30, %s633_s6  }
 0x230   :  { %628 = dma.done.wait [#allocation4], 512  }
 0x231   :  { %629 = vsyncadd [#allocation4], 4294966784 }
 0x232   :  { %337 = vsyncpa [#allocation3], 1 }
 0x233   :  { %338 = vsyncpa [#allocation6], 1 }
 0x234   :  { %339 = vsyncpa [#allocation4], 1 }

</bundles_post_ra>
